<compile_context>
chip_gen: v5e
topology: v5e:2x2
jax: 0.10.0
libtpu: 0.0.40
codegen_flags: <defaults>
</compile_context>

<pallas_src>
import functools

import jax
import jax.numpy as jnp
from jax.experimental import pallas as pl
from jax.experimental.pallas import tpu as pltpu

_SUBLANES = 8
_LANES = 128


def _round_up(x, m):
    return (x + m - 1) // m * m


def _make_kernel(T, TB, V_pad, H, L, cdt):
    """Kernel body for fixed static sizes.

    Inputs (in order):
      x0      : (T, TB, 4H) f32   layer-0 IH term (gathered embedding + bias)
      w_hh[l] : (H, 4H)  cdt      l = 0..L-1
      w_ih[l] : (H, 4H)  cdt      l = 1..L-1   (layer 0 handled by gather)
      b[l]    : (1, 4H)  f32      l = 1..L-1   (b_ih + b_hh)
      w_out   : (H, V_pad) cdt
      b_out   : (1, V_pad) f32
    Output:
      out     : (T, TB, V_pad) f32 logits
    Scratch:
      ih_sc   : (T, TB, 4H) f32   precomputed IH term of the current layer
      hs_sc   : (T, TB, H)  f32   hidden outputs of the current layer, all t
      h_sc    : (TB, H)     f32   recurrent hidden state
      c_sc    : (TB, H)     f32   recurrent cell state
    """
    G = 4 * H

    def kernel(*refs):
        i = 0
        x0_ref = refs[i]; i += 1
        w_hh = refs[i:i + L]; i += L
        w_ih = refs[i:i + (L - 1)]; i += L - 1      # layers 1..L-1
        b_g = refs[i:i + (L - 1)]; i += L - 1       # layers 1..L-1
        w_out_ref = refs[i]; i += 1
        b_out_ref = refs[i]; i += 1
        out_ref = refs[i]; i += 1
        ih_sc, hs_sc, h_sc, c_sc = refs[i:i + 4]

        # Layer-0 input-to-hidden contribution (precomputed in the wrapper).
        ih_sc[...] = x0_ref[...].astype(jnp.float32)

        for l in range(L):
            h_sc[...] = jnp.zeros_like(h_sc)
            c_sc[...] = jnp.zeros_like(c_sc)
            # Hoist the loop-invariant weight load out of the T-loop.
            whh = w_hh[l][...]

            @pl.loop(0, T)
            def _(t):
                # Only h_prev @ W_hh is truly recurrent.
                gates = ih_sc[t] + jnp.dot(
                    h_sc[...].astype(cdt), whh,
                    preferred_element_type=jnp.float32)
                i_g = jax.nn.sigmoid(gates[:, 0 * H:1 * H])
                f_g = jax.nn.sigmoid(gates[:, 1 * H:2 * H])
                g_g = jnp.tanh(gates[:, 2 * H:3 * H])
                o_g = jax.nn.sigmoid(gates[:, 3 * H:4 * H])
                c_new = f_g * c_sc[...] + i_g * g_g
                h_new = o_g * jnp.tanh(c_new)
                c_sc[...] = c_new
                h_sc[...] = h_new
                hs_sc[t] = h_new

            if l + 1 < L:
                # Next layer's IH term for ALL timesteps: one big MXU matmul.
                x_all = hs_sc[...].reshape(T * TB, H).astype(cdt)
                ih_all = jnp.dot(x_all, w_ih[l][...],
                                 preferred_element_type=jnp.float32)
                ih_all = ih_all + b_g[l][...]
                ih_sc[...] = ih_all.reshape(T, TB, G)

        # Batched output projection: one matmul + one lane-dense store.
        x_all = hs_sc[...].reshape(T * TB, H).astype(cdt)
        logits = jnp.dot(x_all, w_out_ref[...],
                         preferred_element_type=jnp.float32)
        logits = logits + b_out_ref[...]
        out_ref[...] = logits.reshape(T, TB, V_pad)

    return kernel


def init_params(key, vocab_size, hidden_size, n_layers):
    """Deterministic PyTorch-style init: U(-1/sqrt(H), 1/sqrt(H)).

    Weights are stored pre-transposed: w_ih (in, 4H), w_hh (H, 4H),
    biases combined (b_ih + b_hh) as (1, 4H).  Everything f32.
    """
    params = {"w_ih": [], "w_hh": [], "b": []}
    k = 1.0 / jnp.sqrt(jnp.float32(hidden_size))
    for l in range(n_layers):
        in_dim = vocab_size if l == 0 else hidden_size
        key, k1, k2, k3, k4 = jax.random.split(key, 5)
        w_ih = jax.random.uniform(k1, (in_dim, 4 * hidden_size),
                                  minval=-k, maxval=k, dtype=jnp.float32)
        w_hh = jax.random.uniform(k2, (hidden_size, 4 * hidden_size),
                                  minval=-k, maxval=k, dtype=jnp.float32)
        b_ih = jax.random.uniform(k3, (4 * hidden_size,),
                                  minval=-k, maxval=k, dtype=jnp.float32)
        b_hh = jax.random.uniform(k4, (4 * hidden_size,),
                                  minval=-k, maxval=k, dtype=jnp.float32)
        params["w_ih"].append(w_ih)
        params["w_hh"].append(w_hh)
        params["b"].append((b_ih + b_hh).reshape(1, 4 * hidden_size))
    key, k1, k2 = jax.random.split(key, 3)
    params["w_out"] = jax.random.uniform(
        k1, (hidden_size, vocab_size), minval=-k, maxval=k, dtype=jnp.float32)
    params["b_out"] = jax.random.uniform(
        k2, (1, vocab_size), minval=-k, maxval=k, dtype=jnp.float32)
    return params


@functools.partial(jax.jit,
                   static_argnames=("hidden_size", "n_layers", "param_dtype"))
def smiles_lstm_forward(in_seq, params, *, hidden_size, n_layers,
                        param_dtype=jnp.float32):
    """Forward pass: one_hot -> n_layers LSTM -> Linear.  Returns (B, T, V)."""
    B, T = in_seq.shape
    V = params["w_out"].shape[1]
    H = hidden_size
    L = n_layers
    G = 4 * H
    cdt = param_dtype

    TB = _SUBLANES                      # batch tile = one sublane group
    BP = _round_up(max(B, TB), TB)      # padded batch
    nb = BP // TB
    Vp = _round_up(V, _LANES)           # lane-dense output width

    # ---- wrapper-side prep (cheap XLA ops, off the serial critical path) ----
    seq = jnp.pad(in_seq.astype(jnp.int32), ((0, BP - B), (0, 0)))
    # layer-0: one_hot(x) @ W_ih is a row gather of W_ih; fold bias 0 in here.
    x0 = jnp.take(params["w_ih"][0], seq, axis=0)               # (BP, T, 4H)
    x0 = (x0 + params["b"][0]).astype(jnp.float32)
    x0 = jnp.transpose(x0, (1, 0, 2))                           # (T, BP, 4H)

    w_hh = [w.astype(cdt) for w in params["w_hh"]]
    w_ih_rest = [w.astype(cdt) for w in params["w_ih"][1:]]
    b_rest = [b.astype(jnp.float32) for b in params["b"][1:]]
    w_out = jnp.pad(params["w_out"], ((0, 0), (0, Vp - V))).astype(cdt)
    b_out = jnp.pad(params["b_out"], ((0, 0), (0, Vp - V))).astype(jnp.float32)

    flat_inputs = [x0] + w_hh + w_ih_rest + b_rest + [w_out, b_out]

    def bcast(shape):
        return pl.BlockSpec(shape, lambda i: (0,) * len(shape))

    in_specs = (
        [pl.BlockSpec((T, TB, G), lambda i: (0, i, 0))]
        + [bcast((H, G)) for _ in w_hh]
        + [bcast((H, G)) for _ in w_ih_rest]
        + [bcast((1, G)) for _ in b_rest]
        + [bcast((H, Vp)), bcast((1, Vp))]
    )

    kernel = _make_kernel(T, TB, Vp, H, L, cdt)

    out = pl.pallas_call(
        kernel,
        out_shape=jax.ShapeDtypeStruct((T, BP, Vp), jnp.float32),
        grid_spec=pltpu.PrefetchScalarGridSpec(
            num_scalar_prefetch=0,
            grid=(nb,),
            in_specs=in_specs,
            out_specs=pl.BlockSpec((T, TB, Vp), lambda i: (0, i, 0)),
            scratch_shapes=[
                pltpu.VMEM((T, TB, G), jnp.float32),   # ih_sc
                pltpu.VMEM((T, TB, H), jnp.float32),   # hs_sc
                pltpu.VMEM((TB, H), jnp.float32),      # h state
                pltpu.VMEM((TB, H), jnp.float32),      # c state
            ],
        ),
        compiler_params=pltpu.CompilerParams(
            dimension_semantics=("parallel",),
        ),
    )(*flat_inputs)

    # (T, BP, Vp) -> (B, T, V)
    return jnp.transpose(out[:, :B, :V], (1, 0, 2))


def reference_forward(in_seq, params, hidden_size, n_layers):
    """Pure-JAX reference (same math as PyTorch SmilesLSTM.forward)."""
    B, T = in_seq.shape
    V = params["w_out"].shape[1]
    H = hidden_size
    x_seq = jax.nn.one_hot(in_seq, V, dtype=jnp.float32)        # (B, T, V)
    h = [jnp.zeros((B, H), jnp.float32) for _ in range(n_layers)]
    c = [jnp.zeros((B, H), jnp.float32) for _ in range(n_layers)]
    outs = []
    for t in range(T):
        x = x_seq[:, t, :]
        for l in range(n_layers):
            gates = (x @ params["w_ih"][l] + h[l] @ params["w_hh"][l]
                     + params["b"][l])
            i_g = jax.nn.sigmoid(gates[:, 0 * H:1 * H])
            f_g = jax.nn.sigmoid(gates[:, 1 * H:2 * H])
            g_g = jnp.tanh(gates[:, 2 * H:3 * H])
            o_g = jax.nn.sigmoid(gates[:, 3 * H:4 * H])
            c[l] = f_g * c[l] + i_g * g_g
            h[l] = o_g * jnp.tanh(c[l])
            x = h[l]
        outs.append(x @ params["w_out"] + params["b_out"])
    return jnp.stack(outs, axis=1)


if __name__ == "__main__":
    VOCAB_SIZE = 16     # len(vocab)
    HIDDEN = 32
    N_LAYERS = 2
    BATCH = 2
    SEQ = 8

    key = jax.random.PRNGKey(0)
    key, pkey, skey = jax.random.split(key, 3)
    params = init_params(pkey, VOCAB_SIZE, HIDDEN, N_LAYERS)
    in_seq = jax.random.randint(skey, (BATCH, SEQ), 0, VOCAB_SIZE,
                                dtype=jnp.int32)

    ref = reference_forward(in_seq, params, HIDDEN, N_LAYERS)

    # f32 weights (exact-ish match against reference)
    out = smiles_lstm_forward(in_seq, params,
                              hidden_size=HIDDEN, n_layers=N_LAYERS)
    out = jax.block_until_ready(out)
    assert out.shape == (BATCH, SEQ, VOCAB_SIZE)
    assert jnp.allclose(out, ref, atol=1e-4, rtol=1e-4), "f32 mismatch vs ref"

    # bf16 matmul weights (MXU-friendly on v5e/v6e; f32 accumulation/gates)
    out_bf16 = smiles_lstm_forward(in_seq, params,
                                   hidden_size=HIDDEN, n_layers=N_LAYERS,
                                   param_dtype=jnp.bfloat16)
    out_bf16 = jax.block_until_ready(out_bf16)
    assert out_bf16.shape == (BATCH, SEQ, VOCAB_SIZE)
    assert jnp.allclose(out_bf16, ref, atol=1e-1, rtol=1e-1), "bf16 mismatch"

    # TODO(synk): generate() (OneHotCategorical sampling loop) is stochastic
    # inference-time decoding, not part of the forward hot path; not ported.
    print("KERNEL_OK")
</pallas_src>

<mosaic_0001>
module attributes {stable_mosaic.version = 11 : i64} {
  func.func @kernel(%arg0: i32, %arg1: memref<8x8x128xf32, #tpu.memory_space<vmem>>, %arg2: memref<32x128xf32, #tpu.memory_space<vmem>>, %arg3: memref<32x128xf32, #tpu.memory_space<vmem>>, %arg4: memref<32x128xf32, #tpu.memory_space<vmem>>, %arg5: memref<1x128xf32, #tpu.memory_space<vmem>>, %arg6: memref<32x128xf32, #tpu.memory_space<vmem>>, %arg7: memref<1x128xf32, #tpu.memory_space<vmem>>, %arg8: memref<8x8x128xf32, #tpu.memory_space<vmem>>, %arg9: memref<8x8x128xf32, #tpu.memory_space<vmem>>, %arg10: memref<8x8x32xf32, #tpu.memory_space<vmem>>, %arg11: memref<8x32xf32, #tpu.memory_space<vmem>>, %arg12: memref<8x32xf32, #tpu.memory_space<vmem>>) attributes {dimension_semantics = [#tpu.dimension_semantics<parallel>], iteration_bounds = array<i64: 1>, scalar_prefetch = 0 : i64, scratch_operands = 4 : i64, tpu.core_type = #tpu.core_type<tc>, window_params = [{transform_indices = @transform_0, window_bounds = array<i64: 8, 8, 128>}, {pipeline_mode = #tpu.pipeline_mode<synchronous>, transform_indices = @transform_1, window_bounds = array<i64: 32, 128>}, {pipeline_mode = #tpu.pipeline_mode<synchronous>, transform_indices = @transform_2, window_bounds = array<i64: 32, 128>}, {pipeline_mode = #tpu.pipeline_mode<synchronous>, transform_indices = @transform_3, window_bounds = array<i64: 32, 128>}, {pipeline_mode = #tpu.pipeline_mode<synchronous>, transform_indices = @transform_4, window_bounds = array<i64: 1, 128>}, {pipeline_mode = #tpu.pipeline_mode<synchronous>, transform_indices = @transform_5, window_bounds = array<i64: 32, 128>}, {pipeline_mode = #tpu.pipeline_mode<synchronous>, transform_indices = @transform_6, window_bounds = array<i64: 1, 128>}, {transform_indices = @transform_7, window_bounds = array<i64: 8, 8, 128>}]} {
    %c0 = arith.constant 0 : index
    %c0_0 = arith.constant 0 : index
    %c0_1 = arith.constant 0 : index
    %0 = vector.load %arg1[%c0, %c0_0, %c0_1] : memref<8x8x128xf32, #tpu.memory_space<vmem>>, vector<8x8x128xf32>
    %c0_2 = arith.constant 0 : index
    %c0_3 = arith.constant 0 : index
    %c0_4 = arith.constant 0 : index
    %1 = vector.load %arg9[%c0_2, %c0_3, %c0_4] : memref<8x8x128xf32, #tpu.memory_space<vmem>>, vector<8x8x128xf32>
    tpu.vector_store %arg9[%c0_2, %c0_3, %c0_4], %0 {strides = array<i32>} : memref<8x8x128xf32, #tpu.memory_space<vmem>>, vector<8x8x128xf32>,
    %cst = arith.constant 0.000000e+00 : f32
    %2 = vector.broadcast %cst : f32 to vector<8x32xf32>
    %c0_5 = arith.constant 0 : index
    %c0_6 = arith.constant 0 : index
    %3 = vector.load %arg11[%c0_5, %c0_6] : memref<8x32xf32, #tpu.memory_space<vmem>>, vector<8x32xf32>
    tpu.vector_store %arg11[%c0_5, %c0_6], %2 {strides = array<i32>} : memref<8x32xf32, #tpu.memory_space<vmem>>, vector<8x32xf32>,
    %cst_7 = arith.constant 0.000000e+00 : f32
    %4 = vector.broadcast %cst_7 : f32 to vector<8x32xf32>
    %c0_8 = arith.constant 0 : index
    %c0_9 = arith.constant 0 : index
    %5 = vector.load %arg12[%c0_8, %c0_9] : memref<8x32xf32, #tpu.memory_space<vmem>>, vector<8x32xf32>
    tpu.vector_store %arg12[%c0_8, %c0_9], %4 {strides = array<i32>} : memref<8x32xf32, #tpu.memory_space<vmem>>, vector<8x32xf32>,
    %c0_10 = arith.constant 0 : index
    %c0_11 = arith.constant 0 : index
    %6 = vector.load %arg2[%c0_10, %c0_11] : memref<32x128xf32, #tpu.memory_space<vmem>>, vector<32x128xf32>
    %c0_i32 = arith.constant 0 : i32
    %c8_i32 = arith.constant 8 : i32
    %7 = arith.addi %c0_i32, %c8_i32 : i32
    %c1_i32 = arith.constant 1 : i32
    scf.for %arg13 = %c0_i32 to %7 step %c1_i32  : i32 {
      %c1_i32_47 = arith.constant 1 : i32
      %32 = arith.muli %arg13, %c1_i32_47 : i32
      %c0_i32_48 = arith.constant 0 : i32
      %33 = arith.addi %c0_i32_48, %32 : i32
      %34 = arith.index_cast %33 : i32 to index
      %c0_49 = arith.constant 0 : index
      %c0_50 = arith.constant 0 : index
      %35 = vector.load %arg9[%34, %c0_49, %c0_50] : memref<8x8x128xf32, #tpu.memory_space<vmem>>, vector<1x8x128xf32>
      %36 = vector.shape_cast %35 : vector<1x8x128xf32> to vector<8x128xf32>
      %c0_51 = arith.constant 0 : index
      %c0_52 = arith.constant 0 : index
      %37 = vector.load %arg11[%c0_51, %c0_52] : memref<8x32xf32, #tpu.memory_space<vmem>>, vector<8x32xf32>
      %cst_53 = arith.constant dense<0.000000e+00> : vector<8x128xf32>
      %38 = tpu.matmul %37, %6, %cst_53 {dimension_numbers = #tpu.dot_dimension_numbers<[1], [0], [0], [1], [0, 0, 1, 1], [], []>} : vector<8x32xf32>, vector<32x128xf32>, vector<8x128xf32> -> vector<8x128xf32>
      %39 = arith.addf %36, %38 : vector<8x128xf32>
      %40 = vector.extract_strided_slice %39 {offsets = [0, 0], sizes = [8, 32], strides = [1, 1]} : vector<8x128xf32> to vector<8x32xf32>
      %41 = arith.negf %40 : vector<8x32xf32>
      %42 = math.exp %41 : vector<8x32xf32>
      %cst_54 = arith.constant 1.000000e+00 : f32
      %43 = vector.broadcast %cst_54 : f32 to vector<8x32xf32>
      %44 = arith.addf %43, %42 : vector<8x32xf32>
      %45 = arith.divf %43, %44 : vector<8x32xf32>
      %46 = vector.extract_strided_slice %39 {offsets = [0, 32], sizes = [8, 32], strides = [1, 1]} : vector<8x128xf32> to vector<8x32xf32>
      %47 = arith.negf %46 : vector<8x32xf32>
      %48 = math.exp %47 : vector<8x32xf32>
      %cst_55 = arith.constant 1.000000e+00 : f32
      %49 = vector.broadcast %cst_55 : f32 to vector<8x32xf32>
      %50 = arith.addf %49, %48 : vector<8x32xf32>
      %51 = arith.divf %49, %50 : vector<8x32xf32>
      %52 = vector.extract_strided_slice %39 {offsets = [0, 64], sizes = [8, 32], strides = [1, 1]} : vector<8x128xf32> to vector<8x32xf32>
      %53 = math.tanh %52 : vector<8x32xf32>
      %54 = vector.extract_strided_slice %39 {offsets = [0, 96], sizes = [8, 32], strides = [1, 1]} : vector<8x128xf32> to vector<8x32xf32>
      %55 = arith.negf %54 : vector<8x32xf32>
      %56 = math.exp %55 : vector<8x32xf32>
      %cst_56 = arith.constant 1.000000e+00 : f32
      %57 = vector.broadcast %cst_56 : f32 to vector<8x32xf32>
      %58 = arith.addf %57, %56 : vector<8x32xf32>
      %59 = arith.divf %57, %58 : vector<8x32xf32>
      %c0_57 = arith.constant 0 : index
      %c0_58 = arith.constant 0 : index
      %60 = vector.load %arg12[%c0_57, %c0_58] : memref<8x32xf32, #tpu.memory_space<vmem>>, vector<8x32xf32>
      %61 = arith.mulf %51, %60 : vector<8x32xf32>
      %62 = arith.mulf %45, %53 : vector<8x32xf32>
      %63 = arith.addf %61, %62 : vector<8x32xf32>
      %64 = math.tanh %63 : vector<8x32xf32>
      %65 = arith.mulf %59, %64 : vector<8x32xf32>
      %c0_59 = arith.constant 0 : index
      %c0_60 = arith.constant 0 : index
      %66 = vector.load %arg12[%c0_59, %c0_60] : memref<8x32xf32, #tpu.memory_space<vmem>>, vector<8x32xf32>
      tpu.vector_store %arg12[%c0_59, %c0_60], %63 {strides = array<i32>} : memref<8x32xf32, #tpu.memory_space<vmem>>, vector<8x32xf32>,
      %c0_61 = arith.constant 0 : index
      %c0_62 = arith.constant 0 : index
      %67 = vector.load %arg11[%c0_61, %c0_62] : memref<8x32xf32, #tpu.memory_space<vmem>>, vector<8x32xf32>
      tpu.vector_store %arg11[%c0_61, %c0_62], %65 {strides = array<i32>} : memref<8x32xf32, #tpu.memory_space<vmem>>, vector<8x32xf32>,
      %68 = arith.index_cast %33 : i32 to index
      %c0_63 = arith.constant 0 : index
      %c0_64 = arith.constant 0 : index
      %69 = vector.load %arg10[%68, %c0_63, %c0_64] : memref<8x8x32xf32, #tpu.memory_space<vmem>>, vector<1x8x32xf32>
      %70 = vector.shape_cast %69 : vector<1x8x32xf32> to vector<8x32xf32>
      %71 = vector.shape_cast %65 : vector<8x32xf32> to vector<1x8x32xf32>
      tpu.vector_store %arg10[%68, %c0_63, %c0_64], %71 {strides = array<i32>} : memref<8x8x32xf32, #tpu.memory_space<vmem>>, vector<1x8x32xf32>,
    }
    %c8_i32_12 = arith.constant 8 : i32
    %c0_13 = arith.constant 0 : index
    %c0_14 = arith.constant 0 : index
    %c0_15 = arith.constant 0 : index
    %8 = vector.load %arg10[%c0_13, %c0_14, %c0_15] : memref<8x8x32xf32, #tpu.memory_space<vmem>>, vector<8x8x32xf32>
    %9 = vector.shape_cast %8 : vector<8x8x32xf32> to vector<64x32xf32>
    %c0_16 = arith.constant 0 : index
    %c0_17 = arith.constant 0 : index
    %10 = vector.load %arg4[%c0_16, %c0_17] : memref<32x128xf32, #tpu.memory_space<vmem>>, vector<32x128xf32>
    %cst_18 = arith.constant dense<0.000000e+00> : vector<64x128xf32>
    %11 = tpu.matmul %9, %10, %cst_18 {dimension_numbers = #tpu.dot_dimension_numbers<[1], [0], [0], [1], [0, 0, 1, 1], [], []>} : vector<64x32xf32>, vector<32x128xf32>, vector<64x128xf32> -> vector<64x128xf32>
    %c0_19 = arith.constant 0 : index
    %c0_20 = arith.constant 0 : index
    %12 = vector.load %arg5[%c0_19, %c0_20] : memref<1x128xf32, #tpu.memory_space<vmem>>, vector<1x128xf32>
    %13 = vector.broadcast %12 : vector<1x128xf32> to vector<64x128xf32>
    %14 = arith.addf %11, %13 : vector<64x128xf32>
    %15 = vector.shape_cast %14 : vector<64x128xf32> to vector<8x8x128xf32>
    %c0_21 = arith.constant 0 : index
    %c0_22 = arith.constant 0 : index
    %c0_23 = arith.constant 0 : index
    %16 = vector.load %arg9[%c0_21, %c0_22, %c0_23] : memref<8x8x128xf32, #tpu.memory_space<vmem>>, vector<8x8x128xf32>
    tpu.vector_store %arg9[%c0_21, %c0_22, %c0_23], %15 {strides = array<i32>} : memref<8x8x128xf32, #tpu.memory_space<vmem>>, vector<8x8x128xf32>,
    %cst_24 = arith.constant 0.000000e+00 : f32
    %17 = vector.broadcast %cst_24 : f32 to vector<8x32xf32>
    %c0_25 = arith.constant 0 : index
    %c0_26 = arith.constant 0 : index
    %18 = vector.load %arg11[%c0_25, %c0_26] : memref<8x32xf32, #tpu.memory_space<vmem>>, vector<8x32xf32>
    tpu.vector_store %arg11[%c0_25, %c0_26], %17 {strides = array<i32>} : memref<8x32xf32, #tpu.memory_space<vmem>>, vector<8x32xf32>,
    %cst_27 = arith.constant 0.000000e+00 : f32
    %19 = vector.broadcast %cst_27 : f32 to vector<8x32xf32>
    %c0_28 = arith.constant 0 : index
    %c0_29 = arith.constant 0 : index
    %20 = vector.load %arg12[%c0_28, %c0_29] : memref<8x32xf32, #tpu.memory_space<vmem>>, vector<8x32xf32>
    tpu.vector_store %arg12[%c0_28, %c0_29], %19 {strides = array<i32>} : memref<8x32xf32, #tpu.memory_space<vmem>>, vector<8x32xf32>,
    %c0_30 = arith.constant 0 : index
    %c0_31 = arith.constant 0 : index
    %21 = vector.load %arg3[%c0_30, %c0_31] : memref<32x128xf32, #tpu.memory_space<vmem>>, vector<32x128xf32>
    %c0_i32_32 = arith.constant 0 : i32
    %c8_i32_33 = arith.constant 8 : i32
    %22 = arith.addi %c0_i32_32, %c8_i32_33 : i32
    %c1_i32_34 = arith.constant 1 : i32
    scf.for %arg13 = %c0_i32_32 to %22 step %c1_i32_34  : i32 {
      %c1_i32_47 = arith.constant 1 : i32
      %32 = arith.muli %arg13, %c1_i32_47 : i32
      %c0_i32_48 = arith.constant 0 : i32
      %33 = arith.addi %c0_i32_48, %32 : i32
      %34 = arith.index_cast %33 : i32 to index
      %c0_49 = arith.constant 0 : index
      %c0_50 = arith.constant 0 : index
      %35 = vector.load %arg9[%34, %c0_49, %c0_50] : memref<8x8x128xf32, #tpu.memory_space<vmem>>, vector<1x8x128xf32>
      %36 = vector.shape_cast %35 : vector<1x8x128xf32> to vector<8x128xf32>
      %c0_51 = arith.constant 0 : index
      %c0_52 = arith.constant 0 : index
      %37 = vector.load %arg11[%c0_51, %c0_52] : memref<8x32xf32, #tpu.memory_space<vmem>>, vector<8x32xf32>
      %cst_53 = arith.constant dense<0.000000e+00> : vector<8x128xf32>
      %38 = tpu.matmul %37, %21, %cst_53 {dimension_numbers = #tpu.dot_dimension_numbers<[1], [0], [0], [1], [0, 0, 1, 1], [], []>} : vector<8x32xf32>, vector<32x128xf32>, vector<8x128xf32> -> vector<8x128xf32>
      %39 = arith.addf %36, %38 : vector<8x128xf32>
      %40 = vector.extract_strided_slice %39 {offsets = [0, 0], sizes = [8, 32], strides = [1, 1]} : vector<8x128xf32> to vector<8x32xf32>
      %41 = arith.negf %40 : vector<8x32xf32>
      %42 = math.exp %41 : vector<8x32xf32>
      %cst_54 = arith.constant 1.000000e+00 : f32
      %43 = vector.broadcast %cst_54 : f32 to vector<8x32xf32>
      %44 = arith.addf %43, %42 : vector<8x32xf32>
      %45 = arith.divf %43, %44 : vector<8x32xf32>
      %46 = vector.extract_strided_slice %39 {offsets = [0, 32], sizes = [8, 32], strides = [1, 1]} : vector<8x128xf32> to vector<8x32xf32>
      %47 = arith.negf %46 : vector<8x32xf32>
      %48 = math.exp %47 : vector<8x32xf32>
      %cst_55 = arith.constant 1.000000e+00 : f32
      %49 = vector.broadcast %cst_55 : f32 to vector<8x32xf32>
      %50 = arith.addf %49, %48 : vector<8x32xf32>
      %51 = arith.divf %49, %50 : vector<8x32xf32>
      %52 = vector.extract_strided_slice %39 {offsets = [0, 64], sizes = [8, 32], strides = [1, 1]} : vector<8x128xf32> to vector<8x32xf32>
      %53 = math.tanh %52 : vector<8x32xf32>
      %54 = vector.extract_strided_slice %39 {offsets = [0, 96], sizes = [8, 32], strides = [1, 1]} : vector<8x128xf32> to vector<8x32xf32>
      %55 = arith.negf %54 : vector<8x32xf32>
      %56 = math.exp %55 : vector<8x32xf32>
      %cst_56 = arith.constant 1.000000e+00 : f32
      %57 = vector.broadcast %cst_56 : f32 to vector<8x32xf32>
      %58 = arith.addf %57, %56 : vector<8x32xf32>
      %59 = arith.divf %57, %58 : vector<8x32xf32>
      %c0_57 = arith.constant 0 : index
      %c0_58 = arith.constant 0 : index
      %60 = vector.load %arg12[%c0_57, %c0_58] : memref<8x32xf32, #tpu.memory_space<vmem>>, vector<8x32xf32>
      %61 = arith.mulf %51, %60 : vector<8x32xf32>
      %62 = arith.mulf %45, %53 : vector<8x32xf32>
      %63 = arith.addf %61, %62 : vector<8x32xf32>
      %64 = math.tanh %63 : vector<8x32xf32>
      %65 = arith.mulf %59, %64 : vector<8x32xf32>
      %c0_59 = arith.constant 0 : index
      %c0_60 = arith.constant 0 : index
      %66 = vector.load %arg12[%c0_59, %c0_60] : memref<8x32xf32, #tpu.memory_space<vmem>>, vector<8x32xf32>
      tpu.vector_store %arg12[%c0_59, %c0_60], %63 {strides = array<i32>} : memref<8x32xf32, #tpu.memory_space<vmem>>, vector<8x32xf32>,
      %c0_61 = arith.constant 0 : index
      %c0_62 = arith.constant 0 : index
      %67 = vector.load %arg11[%c0_61, %c0_62] : memref<8x32xf32, #tpu.memory_space<vmem>>, vector<8x32xf32>
      tpu.vector_store %arg11[%c0_61, %c0_62], %65 {strides = array<i32>} : memref<8x32xf32, #tpu.memory_space<vmem>>, vector<8x32xf32>,
      %68 = arith.index_cast %33 : i32 to index
      %c0_63 = arith.constant 0 : index
      %c0_64 = arith.constant 0 : index
      %69 = vector.load %arg10[%68, %c0_63, %c0_64] : memref<8x8x32xf32, #tpu.memory_space<vmem>>, vector<1x8x32xf32>
      %70 = vector.shape_cast %69 : vector<1x8x32xf32> to vector<8x32xf32>
      %71 = vector.shape_cast %65 : vector<8x32xf32> to vector<1x8x32xf32>
      tpu.vector_store %arg10[%68, %c0_63, %c0_64], %71 {strides = array<i32>} : memref<8x8x32xf32, #tpu.memory_space<vmem>>, vector<1x8x32xf32>,
    }
    %c8_i32_35 = arith.constant 8 : i32
    %c0_36 = arith.constant 0 : index
    %c0_37 = arith.constant 0 : index
    %c0_38 = arith.constant 0 : index
    %23 = vector.load %arg10[%c0_36, %c0_37, %c0_38] : memref<8x8x32xf32, #tpu.memory_space<vmem>>, vector<8x8x32xf32>
    %24 = vector.shape_cast %23 : vector<8x8x32xf32> to vector<64x32xf32>
    %c0_39 = arith.constant 0 : index
    %c0_40 = arith.constant 0 : index
    %25 = vector.load %arg6[%c0_39, %c0_40] : memref<32x128xf32, #tpu.memory_space<vmem>>, vector<32x128xf32>
    %cst_41 = arith.constant dense<0.000000e+00> : vector<64x128xf32>
    %26 = tpu.matmul %24, %25, %cst_41 {dimension_numbers = #tpu.dot_dimension_numbers<[1], [0], [0], [1], [0, 0, 1, 1], [], []>} : vector<64x32xf32>, vector<32x128xf32>, vector<64x128xf32> -> vector<64x128xf32>
    %c0_42 = arith.constant 0 : index
    %c0_43 = arith.constant 0 : index
    %27 = vector.load %arg7[%c0_42, %c0_43] : memref<1x128xf32, #tpu.memory_space<vmem>>, vector<1x128xf32>
    %28 = vector.broadcast %27 : vector<1x128xf32> to vector<64x128xf32>
    %29 = arith.addf %26, %28 : vector<64x128xf32>
    %30 = vector.shape_cast %29 : vector<64x128xf32> to vector<8x8x128xf32>
    %c0_44 = arith.constant 0 : index
    %c0_45 = arith.constant 0 : index
    %c0_46 = arith.constant 0 : index
    %31 = vector.load %arg8[%c0_44, %c0_45, %c0_46] : memref<8x8x128xf32, #tpu.memory_space<vmem>>, vector<8x8x128xf32>
    tpu.vector_store %arg8[%c0_44, %c0_45, %c0_46], %30 {strides = array<i32>} : memref<8x8x128xf32, #tpu.memory_space<vmem>>, vector<8x8x128xf32>,
    return
  }
  func.func @transform_0(%arg0: i32) -> (i32, i32, i32) {
    %c0_i32 = arith.constant 0 : i32
    %c0_i32_0 = arith.constant 0 : i32
    %c0_i32_1 = arith.constant 0 : i32
    return %c0_i32, %arg0, %c0_i32_0 : i32, i32, i32
  }
  func.func @transform_1(%arg0: i32) -> (i32, i32) {
    %c0_i32 = arith.constant 0 : i32
    %c0_i32_0 = arith.constant 0 : i32
    %c0_i32_1 = arith.constant 0 : i32
    return %c0_i32, %c0_i32_0 : i32, i32
  }
  func.func @transform_2(%arg0: i32) -> (i32, i32) {
    %c0_i32 = arith.constant 0 : i32
    %c0_i32_0 = arith.constant 0 : i32
    %c0_i32_1 = arith.constant 0 : i32
    return %c0_i32, %c0_i32_0 : i32, i32
  }
  func.func @transform_3(%arg0: i32) -> (i32, i32) {
    %c0_i32 = arith.constant 0 : i32
    %c0_i32_0 = arith.constant 0 : i32
    %c0_i32_1 = arith.constant 0 : i32
    return %c0_i32, %c0_i32_0 : i32, i32
  }
  func.func @transform_4(%arg0: i32) -> (i32, i32) {
    %c0_i32 = arith.constant 0 : i32
    %c0_i32_0 = arith.constant 0 : i32
    %c0_i32_1 = arith.constant 0 : i32
    return %c0_i32, %c0_i32_0 : i32, i32
  }
  func.func @transform_5(%arg0: i32) -> (i32, i32) {
    %c0_i32 = arith.constant 0 : i32
    %c0_i32_0 = arith.constant 0 : i32
    %c0_i32_1 = arith.constant 0 : i32
    return %c0_i32, %c0_i32_0 : i32, i32
  }
  func.func @transform_6(%arg0: i32) -> (i32, i32) {
    %c0_i32 = arith.constant 0 : i32
    %c0_i32_0 = arith.constant 0 : i32
    %c0_i32_1 = arith.constant 0 : i32
    return %c0_i32, %c0_i32_0 : i32, i32
  }
  func.func @transform_7(%arg0: i32) -> (i32, i32, i32) {
    %c0_i32 = arith.constant 0 : i32
    %c0_i32_0 = arith.constant 0 : i32
    %c0_i32_1 = arith.constant 0 : i32
    return %c0_i32, %arg0, %c0_i32_0 : i32, i32, i32
  }
}

</mosaic_0001>

<bundles_post_ra>
// kernel: smiles_lstm_forward.1
= control target key start
LH: loop header
LB: loop body
LE: loop exit
PB: predicated region body
PF: predicated region fallthrough
CT: control target
= control target key end

     0   :  { %vm42_vm0 = vcmask 261120   ;;  %v534_v3 = vmov 0.0   ;;  %s629_s25 = smov 0   ;;  %s775_s0 = inlined_call_operand.vmem [shape: f32[8,8,128], index: 0, kind: input, shape index: {}]   ;;  %s776_s1 = inlined_call_operand.vmem [shape: f32[32,128], index: 1, kind: input, shape index: {}]   ;;  %s777_s2 = inlined_call_operand.vmem [shape: f32[32,128], index: 2, kind: input, shape index: {}]   ;;  %s778_s3 = inlined_call_operand.vmem [shape: f32[32,128], index: 3, kind: input, shape index: {}]   ;;  %s779_s4 = inlined_call_operand.vmem [shape: f32[1,128], index: 4, kind: input, shape index: {}]   ;;  %s780_s5 = inlined_call_operand.vmem [shape: f32[32,128], index: 5, kind: input, shape index: {}]   ;;  %s781_s6 = inlined_call_operand.vmem [shape: f32[1,128], index: 6, kind: input, shape index: {}]   ;;  %s782_s7 = inlined_call_operand.vmem [shape: f32[8,8,128], index: 7, kind: output, shape index: {}]  }
   0x1   :  { %v26_v0 = vld [vmem:[%s775_s0] sm:$0xff]  ;;  %v27_v1 = vld [vmem:[%s775_s0 + $0x8] sm:$0xff]  ;;  %v28_v2 = vld [vmem:[%s775_s0 + $0x10] sm:$0xff]  ;;  %43 = vst.msk [vmem:[#allocation4] sm:$0xff] %vm42_vm0, %v534_v3 }
   0x2   :  { %34 = vst [vmem:[#allocation2] sm:$0xff] %v26_v0  ;;  %v29_v4 = vld [vmem:[%s775_s0 + $0x18] sm:$0xff]  ;;  %v30_v5 = vld [vmem:[%s775_s0 + $0x20] sm:$0xff]  ;;  %v31_v6 = vld [vmem:[%s775_s0 + $0x28] sm:$0xff] }
   0x3   :  { %35 = vst [vmem:[#allocation2 + $0x8] sm:$0xff] %v27_v1  ;;  %v604_v7 = vld [vmem:[%s776_s1] sm:$0xff]  ;;  %v609_v8 = vld [vmem:[%s776_s1 + $0x8] sm:$0xff]  ;;  %v614_v9 = vld [vmem:[%s776_s1 + $0x10] sm:$0xff] }
   0x4   :  { %36 = vst [vmem:[#allocation2 + $0x10] sm:$0xff] %v28_v2  ;;  %v619_v10 = vld [vmem:[%s776_s1 + $0x18] sm:$0xff]  ;;  %v32_v11 = vld [vmem:[%s775_s0 + $0x30] sm:$0xff] }
   0x5   :  { %37 = vst [vmem:[#allocation2 + $0x18] sm:$0xff] %v29_v4  ;;  %v33_v12 = vld [vmem:[%s775_s0 + $0x38] sm:$0xff] }
   0x6   :  { %38 = vst [vmem:[#allocation2 + $0x20] sm:$0xff] %v30_v5 }
   0x7   :  { %39 = vst [vmem:[#allocation2 + $0x28] sm:$0xff] %v31_v6 }
   0x8   :  { %40 = vst [vmem:[#allocation2 + $0x30] sm:$0xff] %v32_v11 }
   0x9   :  { %41 = vst [vmem:[#allocation2 + $0x38] sm:$0xff] %v33_v12 }
   0xa   :  { %44 = vst.msk [vmem:[#allocation5] sm:$0xff] %vm42_vm0, %v534_v3 }
   0xb LB: > { %74 = vmatpush.msra.mxu0 %v619_v10  ;;  %v58_v13 = vld [vmem:[#allocation4] sm:$0xff]  ;;  %s431_s0 = sshll.u32 %s528_s25, 3  ;;  %s535_s26 = smov 64   ;;  %s528_s25 = sphi %s629_s25, %s54_s25  }
   0xc   : > { %s56_s1 = scalar_lea.vmem [#allocation2], %s431_s0  ;;  %s536_s27 = smov 32  }
   0xd   : > { %75 = vmatpush.msra.mxu0 %v614_v9  ;;  %s537_s28 = smov 96   ;;  %s135_s29 = scalar_lea.vmem [#allocation3], %s431_s0 }
   0xe   : > { %s54_s25 = sadd.s32 1, %s528_s25  }
   0xf   : > { %76 = vmatpush.msra.mxu0 %v609_v8  ;;  %p51_p0 = scmp.ge.s32.totalorder %s54_s25, 8  }
  0x10   : > { %v57_v14 = vld [vmem:[%s56_s1] sm:$0xff]  ;;  %v148_v43 = vld [vmem:[%s778_s3 + $0x18] sm:$0xff] (%p51_p0)  ;;  %v147_v44 = vld [vmem:[%s778_s3 + $0x10] sm:$0xff] (%p51_p0) }
  0x11   : > { %77 = vmatpush.msra.mxu0 %v604_v7  ;;  %v103_v18 = vld [vmem:[#allocation5] sm:$0xff]  ;;  %454 = vmatpush.msra.mxu2 (%p51_p0), %v148_v43  ;;  %v145_v46 = vld [vmem:[%s778_s3] sm:$0xff] (%p51_p0)  ;;  %v692_v57 = vld [vmem:[%s777_s2 + $0x10] sm:$0xff] (%p51_p0) }
  0x12   : > { %432 = vmatmul.msk.f32.vlgmr.msra.gmra.mxu0 %vm42_vm0, %v58_v13  ;;  %455 = vmatpush.msra.mxu3 (%p51_p0), %v148_v43  ;;  %v146_v45 = vld [vmem:[%s778_s3 + $0x8] sm:$0xff] (%p51_p0)  ;;  %v682_v55 = vld [vmem:[%s777_s2] sm:$0xff] (%p51_p0)  ;;  %v697_v58 = vld [vmem:[%s777_s2 + $0x18] sm:$0xff] (%p51_p0) }
  0x13   :  { %189 = vmatpush.msra.mxu0 (%p51_p0), %v148_v43  ;;  %453 = vmatpush.msra.mxu1 (%p51_p0), %v148_v43  ;;  %v687_v56 = vld [vmem:[%s777_s2 + $0x8] sm:$0xff] (%p51_p0)  ;;  %v508_v59 = vld [vmem:[%s779_s4] ss:$0 sm:$0xff] (%p51_p0)  ;;  %s702_s2 = smov (%p51_p0), 0  }
  0x14   :  { %457 = vmatpush.msra.mxu2 (%p51_p0), %v147_v44  ;;  %458 = vmatpush.msra.mxu3 (%p51_p0), %v147_v44 }
  0x15   :  { %190 = vmatpush.msra.mxu0 (%p51_p0), %v147_v44  ;;  %456 = vmatpush.msra.mxu1 (%p51_p0), %v147_v44 }
  0x16   :  { %460 = vmatpush.msra.mxu2 (%p51_p0), %v146_v45  ;;  %461 = vmatpush.msra.mxu3 (%p51_p0), %v146_v45 }
  0x17   :  { %191 = vmatpush.msra.mxu0 (%p51_p0), %v146_v45  ;;  %459 = vmatpush.msra.mxu1 (%p51_p0), %v146_v45 }
  0x18   :  { %463 = vmatpush.msra.mxu2 (%p51_p0), %v145_v46  ;;  %464 = vmatpush.msra.mxu3 (%p51_p0), %v145_v46 }
  0x19   :  { %192 = vmatpush.msra.mxu0 (%p51_p0), %v145_v46  ;;  %462 = vmatpush.msra.mxu1 (%p51_p0), %v145_v46 }
  0x8f   : > { %v79_v15 = vpop.f32.mrf.mxu0 }
  0x90   : > { %v82_v16 = vadd.f32 %v79_v15, %v57_v14 }
  0x92   : > { %500 = vtanh.f32 %v82_v16  ;;  %v433_v19 = vmul.f32 -1.442695, %v82_v16 }
  0x94   : > { %502 = vpow2.f32 %v433_v19 }
  0x98   : > { %v501_v17 = vpop.eup %500 }
  0x99   : > { %110 = vrot.lane.b32.xlu0 %v501_v17, %s535_s26 }
  0x9a   : > { %v503_v20 = vpop.eup %502 }
  0x9b   : > { %v86_v21 = vadd.f32 1.0, %v503_v20 }
  0x9d   : > { %504 = vrcp.f32 %v86_v21  ;;  %v98_v27 = vand.u32 2147483648, %v86_v21  ;;  %vm92_vm2 = vweird.f32 %v86_v21  ;;  %v96_v28 = vand.u32 2147483647, %v86_v21 }
  0x9f   : > { %v99_v30 = vor.u32 1.1754944e-38, %v98_v27  ;;  %vm97_vm4 = vcmp.eq.f32.partialorder %v96_v28, 8.507059e+37 }
  0xa1   : > { %105 = vrot.lane.b32.xlu0 %v103_v18, %s536_s27 }
  0xa3   : > { %v505_v22 = vpop.eup %504 }
  0xa4   : > { %v88_v23 = vmul.f32 %v505_v22, %v86_v21  ;;  %vm93_vm1 = vweird.f32 %v505_v22 }
  0xa5   : > { %vm94_vm3 = vmor %vm92_vm2, %vm93_vm1 }
  0xa6   : > { %v89_v24 = vsub.f32 1.0, %v88_v23 }
  0xa8   : > { %v90_v25 = vmul.f32 %v505_v22, %v89_v24 }
  0xaa   : > { %v91_v26 = vadd.f32 %v505_v22, %v90_v25 }
  0xac   : > { %v95_v29 = vsel %vm94_vm3, %v505_v22, %v91_v26 }
  0xad   : > { %v100_v32 = vsel %vm97_vm4, %v99_v30, %v95_v29 }
 0x10b   : > { %v111_v31 = vpop.permute.xlu0 %110 }
 0x10c   : > { %v113_v33 = vmul.f32 %v111_v31, %v100_v32 }
 0x10e   : > { %115 = vrot.lane.b32.xlu1 %v113_v33, %s536_s27 }
 0x113   : > { %v106_v34 = vpop.permute.xlu0 %105 }
 0x114   : > { %v108_v35 = vmul.f32 %v106_v34, %v100_v32 }
 0x180   : > { %v116_v36 = vpop.permute.xlu1 %115 }
 0x181   : > { %v118_v37 = vadd.f32 %v116_v36, %v108_v35 }
 0x183   : > { %506 = vtanh.f32 %v118_v37  ;;  %126 = vrot.lane.b32.xlu2 %v118_v37, %s537_s28 }
 0x189   : > { %v507_v38 = vpop.eup %506 }
 0x18a   : > { %121 = vrot.lane.b32.xlu1 %v507_v38, %s535_s26 }
 0x1dd   : > { %v127_v39 = vpop.permute.xlu2 %126 }
 0x1de   : > { %129 = vst.msk [vmem:[#allocation5] sm:$0xff] %vm42_vm0, %v127_v39 }
 0x1df   :  { %227 = vst.msk [vmem:[#allocation5] sm:$0xff] (%p51_p0), %vm42_vm0, %v534_v3 }
 0x1fc   : > { %v122_v40 = vpop.permute.xlu1 %121 }
 0x1fd   : > { %v124_v41 = vmul.f32 %v122_v40, %v100_v32 }
 0x1ff   : > { %131 = vrot.lane.b32.xlu2 %v124_v41, %s536_s27 }
 0x257   :  { %53 = sbr.rel (!%p51_p0) target bundleno = 11 (0xb), region = 66 }
 0x259   : > { %v132_v42 = vpop.permute.xlu2 %131 }
 0x25a   : > { %134 = vst.msk [vmem:[#allocation4] sm:$0xff] %vm42_vm0, %v132_v42 }
 0x25b   : > { %136 = vst.msk [vmem:[%s135_s29] sm:$0xff] %vm42_vm0, %v132_v42 }
 0x25c   :  { %226 = vst.msk [vmem:[#allocation4] sm:$0xff] %vm42_vm0, %v534_v3 }
 0x262   :  { %v141_v47 = vld [vmem:[#allocation3 + $0x20] sm:$0xff]  ;;  %v143_v48 = vld [vmem:[#allocation3 + $0x30] sm:$0xff]  ;;  %v142_v51 = vld [vmem:[#allocation3 + $0x28] sm:$0xff] }
 0x263   :  { %v137_v49 = vld [vmem:[#allocation3] sm:$0xff]  ;;  %v139_v50 = vld [vmem:[#allocation3 + $0x10] sm:$0xff]  ;;  %438 = vmatmul.msk.f32.vlgmr.msra.gmra.mxu2 %vm42_vm0, %v141_v47  ;;  %440 = vmatmul.msk.f32.vlgmr.msra.gmra.mxu3 %vm42_vm0, %v143_v48  ;;  %v144_v52 = vld [vmem:[#allocation3 + $0x38] sm:$0xff] }
 0x264   :  { %434 = vmatmul.msk.f32.vlgmr.msra.gmra.mxu0 %vm42_vm0, %v137_v49  ;;  %436 = vmatmul.msk.f32.vlgmr.msra.gmra.mxu1 %vm42_vm0, %v139_v50  ;;  %v138_v53 = vld [vmem:[#allocation3 + $0x8] sm:$0xff]  ;;  %v140_v54 = vld [vmem:[#allocation3 + $0x18] sm:$0xff] }
 0x26b   :  { %439 = vmatmul.msk.f32.gmra.mxu2 %vm42_vm0, %v142_v51  ;;  %441 = vmatmul.msk.f32.gmra.mxu3 %vm42_vm0, %v144_v52 }
 0x26c   :  { %435 = vmatmul.msk.f32.gmra.mxu0 %vm42_vm0, %v138_v53  ;;  %437 = vmatmul.msk.f32.gmra.mxu1 %vm42_vm0, %v140_v54 }
 0x2e1   :  { %v194_v60 = vpop.f32.mrf.mxu0  ;;  %v200_v61 = vpop.f32.mrf.mxu1 }
 0x2e2   :  { %v195_v62 = vadd.f32 %v508_v59, %v194_v60  ;;  %v201_v63 = vadd.f32 %v508_v59, %v200_v61 }
 0x2e4   :  { %218 = vst [vmem:[#allocation2] sm:$0xff] %v195_v62 }
 0x2e5   :  { %220 = vst [vmem:[#allocation2 + $0x10] sm:$0xff] %v201_v63 }
 0x2e6   :  { %v206_v0 = vpop.f32.mrf.mxu2  ;;  %v212_v1 = vpop.f32.mrf.mxu3 }
 0x2e7   :  { %v207_v2 = vadd.f32 %v508_v59, %v206_v0  ;;  %v213_v3 = vadd.f32 %v508_v59, %v212_v1 }
 0x2e9   :  { %222 = vst [vmem:[#allocation2 + $0x20] sm:$0xff] %v207_v2  ;;  %v197_v4 = vpop.f32.mrf.mxu0  ;;  %v203_v5 = vpop.f32.mrf.mxu1 }
 0x2ea   :  { %224 = vst [vmem:[#allocation2 + $0x30] sm:$0xff] %v213_v3  ;;  %v198_v6 = vadd.f32 %v508_v59, %v197_v4  ;;  %v204_v7 = vadd.f32 %v508_v59, %v203_v5 }
 0x2ec   :  { %219 = vst [vmem:[#allocation2 + $0x8] sm:$0xff] %v198_v6 }
 0x2ed   :  { %221 = vst [vmem:[#allocation2 + $0x18] sm:$0xff] %v204_v7 }
 0x2ee   :  { %v209_v8 = vpop.f32.mrf.mxu2  ;;  %v215_v9 = vpop.f32.mrf.mxu3 }
 0x2ef   :  { %v210_v10 = vadd.f32 %v508_v59, %v209_v8  ;;  %v216_v11 = vadd.f32 %v508_v59, %v215_v9 }
 0x2f1   :  { %223 = vst [vmem:[#allocation2 + $0x28] sm:$0xff] %v210_v10 }
 0x2f2   :  { %225 = vst [vmem:[#allocation2 + $0x38] sm:$0xff] %v216_v11 }
 0x2f3 LB: > { %257 = vmatpush.msra.mxu0 %v697_v58  ;;  %v241_v12 = vld [vmem:[#allocation4] sm:$0xff]  ;;  %s442_s4 = sshll.u32 %s532_s2, 3  ;;  %s538_s25 = smov 64   ;;  %v286_v17 = vld [vmem:[#allocation5] sm:$0xff]  ;;  %s532_s2 = sphi %s702_s2, %s237_s2  }
 0x2f4   : > { %s239_s24 = scalar_lea.vmem [#allocation2], %s442_s4  ;;  %s539_s0 = smov 32  }
 0x2f5   : > { %258 = vmatpush.msra.mxu0 %v692_v57  ;;  %s540_s1 = smov 96   ;;  %s318_s26 = scalar_lea.vmem [#allocation3], %s442_s4 }
 0x2f6   : > { %s237_s2 = sadd.s32 1, %s532_s2  }
 0x2f7   : > { %259 = vmatpush.msra.mxu0 %v687_v56  ;;  %p234_p1 = scmp.ge.s32.totalorder %s237_s2, 8  }
 0x2f8   :  { %v331_v42 = vld [vmem:[%s780_s5 + $0x18] sm:$0xff] (%p234_p1)  ;;  %v330_v43 = vld [vmem:[%s780_s5 + $0x10] sm:$0xff] (%p234_p1)  ;;  %v329_v44 = vld [vmem:[%s780_s5 + $0x8] sm:$0xff] (%p234_p1) }
 0x2f9   : > { %260 = vmatpush.msra.mxu0 %v682_v55  ;;  %v240_v13 = vld [vmem:[%s239_s24] sm:$0xff]  ;;  %466 = vmatpush.msra.mxu2 (%p234_p1), %v331_v42 }
 0x2fa   : > { %443 = vmatmul.msk.f32.vlgmr.msra.gmra.mxu0 %vm42_vm0, %v241_v12  ;;  %467 = vmatpush.msra.mxu3 (%p234_p1), %v331_v42  ;;  %v328_v45 = vld [vmem:[%s780_s5] sm:$0xff] (%p234_p1) }
 0x2fb   :  { %372 = vmatpush.msra.mxu0 (%p234_p1), %v331_v42  ;;  %465 = vmatpush.msra.mxu1 (%p234_p1), %v331_v42  ;;  %v517_v54 = vld [vmem:[%s781_s6] ss:$0 sm:$0xff] (%p234_p1) }
 0x2fc   :  { %469 = vmatpush.msra.mxu2 (%p234_p1), %v330_v43  ;;  %470 = vmatpush.msra.mxu3 (%p234_p1), %v330_v43 }
 0x2fd   :  { %373 = vmatpush.msra.mxu0 (%p234_p1), %v330_v43  ;;  %468 = vmatpush.msra.mxu1 (%p234_p1), %v330_v43 }
 0x2fe   :  { %472 = vmatpush.msra.mxu2 (%p234_p1), %v329_v44  ;;  %473 = vmatpush.msra.mxu3 (%p234_p1), %v329_v44 }
 0x2ff   :  { %374 = vmatpush.msra.mxu0 (%p234_p1), %v329_v44  ;;  %471 = vmatpush.msra.mxu1 (%p234_p1), %v329_v44 }
 0x300   :  { %475 = vmatpush.msra.mxu2 (%p234_p1), %v328_v45  ;;  %476 = vmatpush.msra.mxu3 (%p234_p1), %v328_v45 }
 0x301   :  { %375 = vmatpush.msra.mxu0 (%p234_p1), %v328_v45  ;;  %474 = vmatpush.msra.mxu1 (%p234_p1), %v328_v45 }
 0x377   : > { %v262_v14 = vpop.f32.mrf.mxu0 }
 0x378   : > { %v265_v15 = vadd.f32 %v262_v14, %v240_v13 }
 0x37a   : > { %509 = vtanh.f32 %v265_v15  ;;  %v444_v18 = vmul.f32 -1.442695, %v265_v15 }
 0x37c   : > { %511 = vpow2.f32 %v444_v18 }
 0x380   : > { %v510_v16 = vpop.eup %509 }
 0x381   : > { %293 = vrot.lane.b32.xlu0 %v510_v16, %s538_s25 }
 0x382   : > { %v512_v19 = vpop.eup %511 }
 0x383   : > { %v269_v20 = vadd.f32 1.0, %v512_v19 }
 0x385   : > { %513 = vrcp.f32 %v269_v20  ;;  %v281_v26 = vand.u32 2147483648, %v269_v20  ;;  %vm275_vm6 = vweird.f32 %v269_v20  ;;  %v279_v27 = vand.u32 2147483647, %v269_v20 }
 0x387   : > { %v282_v29 = vor.u32 1.1754944e-38, %v281_v26  ;;  %vm280_vm8 = vcmp.eq.f32.partialorder %v279_v27, 8.507059e+37 }
 0x389   : > { %288 = vrot.lane.b32.xlu0 %v286_v17, %s539_s0 }
 0x38b   : > { %v514_v21 = vpop.eup %513 }
 0x38c   : > { %v271_v22 = vmul.f32 %v514_v21, %v269_v20  ;;  %vm276_vm5 = vweird.f32 %v514_v21 }
 0x38d   : > { %vm277_vm7 = vmor %vm275_vm6, %vm276_vm5 }
 0x38e   : > { %v272_v23 = vsub.f32 1.0, %v271_v22 }
 0x390   : > { %v273_v24 = vmul.f32 %v514_v21, %v272_v23 }
 0x392   : > { %v274_v25 = vadd.f32 %v514_v21, %v273_v24 }
 0x394   : > { %v278_v28 = vsel %vm277_vm7, %v514_v21, %v274_v25 }
 0x395   : > { %v283_v31 = vsel %vm280_vm8, %v282_v29, %v278_v28 }
 0x3f3   : > { %v294_v30 = vpop.permute.xlu0 %293 }
 0x3f4   : > { %v296_v32 = vmul.f32 %v294_v30, %v283_v31 }
 0x3f6   : > { %298 = vrot.lane.b32.xlu1 %v296_v32, %s539_s0 }
 0x3fb   : > { %v289_v33 = vpop.permute.xlu0 %288 }
 0x3fc   : > { %v291_v34 = vmul.f32 %v289_v33, %v283_v31 }
 0x468   : > { %v299_v35 = vpop.permute.xlu1 %298 }
 0x469   : > { %v301_v36 = vadd.f32 %v299_v35, %v291_v34 }
 0x46b   : > { %515 = vtanh.f32 %v301_v36  ;;  %309 = vrot.lane.b32.xlu2 %v301_v36, %s540_s1 }
 0x471   : > { %v516_v37 = vpop.eup %515 }
 0x472   : > { %304 = vrot.lane.b32.xlu1 %v516_v37, %s538_s25 }
 0x4c5   : > { %v310_v38 = vpop.permute.xlu2 %309 }
 0x4c6   : > { %312 = vst.msk [vmem:[#allocation5] sm:$0xff] %vm42_vm0, %v310_v38 }
 0x4e4   : > { %v305_v39 = vpop.permute.xlu1 %304 }
 0x4e5   : > { %v307_v40 = vmul.f32 %v305_v39, %v283_v31 }
 0x4e7   : > { %314 = vrot.lane.b32.xlu2 %v307_v40, %s539_s0 }
 0x53f   :  { %236 = sbr.rel (!%p234_p1) target bundleno = 755 (0x2f3), region = 77 }
 0x541   : > { %v315_v41 = vpop.permute.xlu2 %314 }
 0x542   : > { %317 = vst.msk [vmem:[#allocation4] sm:$0xff] %vm42_vm0, %v315_v41 }
 0x543   : > { %319 = vst.msk [vmem:[%s318_s26] sm:$0xff] %vm42_vm0, %v315_v41 }
 0x54a   :  { %v324_v46 = vld [vmem:[#allocation3 + $0x20] sm:$0xff]  ;;  %v326_v47 = vld [vmem:[#allocation3 + $0x30] sm:$0xff]  ;;  %v325_v50 = vld [vmem:[#allocation3 + $0x28] sm:$0xff] }
 0x54b   :  { %v320_v48 = vld [vmem:[#allocation3] sm:$0xff]  ;;  %v322_v49 = vld [vmem:[#allocation3 + $0x10] sm:$0xff]  ;;  %449 = vmatmul.msk.f32.vlgmr.msra.gmra.mxu2 %vm42_vm0, %v324_v46  ;;  %451 = vmatmul.msk.f32.vlgmr.msra.gmra.mxu3 %vm42_vm0, %v326_v47  ;;  %v327_v51 = vld [vmem:[#allocation3 + $0x38] sm:$0xff] }
 0x54c   :  { %445 = vmatmul.msk.f32.vlgmr.msra.gmra.mxu0 %vm42_vm0, %v320_v48  ;;  %447 = vmatmul.msk.f32.vlgmr.msra.gmra.mxu1 %vm42_vm0, %v322_v49  ;;  %v321_v52 = vld [vmem:[#allocation3 + $0x8] sm:$0xff]  ;;  %v323_v53 = vld [vmem:[#allocation3 + $0x18] sm:$0xff] }
 0x553   :  { %450 = vmatmul.msk.f32.gmra.mxu2 %vm42_vm0, %v325_v50  ;;  %452 = vmatmul.msk.f32.gmra.mxu3 %vm42_vm0, %v327_v51 }
 0x554   :  { %446 = vmatmul.msk.f32.gmra.mxu0 %vm42_vm0, %v321_v52  ;;  %448 = vmatmul.msk.f32.gmra.mxu1 %vm42_vm0, %v323_v53 }
 0x5c9   :  { %v377_v55 = vpop.f32.mrf.mxu0  ;;  %v383_v56 = vpop.f32.mrf.mxu1 }
 0x5ca   :  { %v378_v57 = vadd.f32 %v517_v54, %v377_v55  ;;  %v384_v58 = vadd.f32 %v517_v54, %v383_v56 }
 0x5cc   :  { %401 = vst [vmem:[%s782_s7] sm:$0xff] %v378_v57 }
 0x5cd   :  { %403 = vst [vmem:[%s782_s7 + $0x10] sm:$0xff] %v384_v58 }
 0x5ce   :  { %v389_v59 = vpop.f32.mrf.mxu2  ;;  %v395_v60 = vpop.f32.mrf.mxu3 }
 0x5cf   :  { %v390_v61 = vadd.f32 %v517_v54, %v389_v59  ;;  %v396_v62 = vadd.f32 %v517_v54, %v395_v60 }
 0x5d1   :  { %405 = vst [vmem:[%s782_s7 + $0x20] sm:$0xff] %v390_v61  ;;  %v380_v63 = vpop.f32.mrf.mxu0  ;;  %v386_v0 = vpop.f32.mrf.mxu1 }
 0x5d2   :  { %407 = vst [vmem:[%s782_s7 + $0x30] sm:$0xff] %v396_v62  ;;  %v381_v1 = vadd.f32 %v517_v54, %v380_v63  ;;  %v387_v2 = vadd.f32 %v517_v54, %v386_v0 }
 0x5d4   :  { %402 = vst [vmem:[%s782_s7 + $0x8] sm:$0xff] %v381_v1 }
 0x5d5   :  { %404 = vst [vmem:[%s782_s7 + $0x18] sm:$0xff] %v387_v2 }
 0x5d6   :  { %v392_v3 = vpop.f32.mrf.mxu2  ;;  %v398_v4 = vpop.f32.mrf.mxu3 }
 0x5d7   :  { %v393_v5 = vadd.f32 %v517_v54, %v392_v3  ;;  %v399_v6 = vadd.f32 %v517_v54, %v398_v4 }
 0x5d9   :  { %406 = vst [vmem:[%s782_s7 + $0x28] sm:$0xff] %v393_v5 }
 0x5da   :  { %408 = vst [vmem:[%s782_s7 + $0x38] sm:$0xff] %v399_v6 }

</bundles_post_ra>
